<compile_context>
chip_gen: v6e
topology: v6e:2x2x1
jax: 0.10.0
libtpu: 0.0.40
codegen_flags: <defaults>
</compile_context>

<pallas_src>
import jax
import jax.numpy as jnp
from jax.experimental import pallas as pl
from jax.experimental.pallas import tpu as pltpu


def _linear_kernel(x_ref, w_ref, b_ref, o_ref):
    # x_ref: (TB, D), w_ref: (D, 8) pre-transposed, b_ref: (1, 8), o_ref: (TB, 8)
    acc = jnp.dot(x_ref[...], w_ref[...], preferred_element_type=jnp.float32)
    o_ref[...] = (acc + b_ref[...].astype(jnp.float32)).astype(o_ref.dtype)


def _vmem_limit_bytes():
    """Per-generation scoped-VMEM budget."""
    try:
        kind = jax.devices()[0].device_kind.lower()
    except Exception:
        kind = ""
    if "v7" in kind:
        return 48 * 1024 * 1024      # v7x: 64 MiB physical per TC
    if "v5" in kind or "v6" in kind:
        return 96 * 1024 * 1024      # v5e / v6e: 128 MiB physical
    return 48 * 1024 * 1024          # unknown: conservative, safe everywhere


def _pick_batch_tile(B, D, x_itemsize, vmem_limit):
    """Byte-budgeted, sublane-aligned batch tile; never 0."""
    align = 8 if x_itemsize >= 4 else 16          # bf16 packs 16 rows/sublane pair
    # x gets ~half the scoped VMEM; 2 pipeline buffers per input block.
    x_budget = vmem_limit // 2
    rows = x_budget // max(1, 2 * D * x_itemsize)
    tb = max(align, (rows // align) * align)
    # No point exceeding (aligned) B.
    b_aligned = ((B + align - 1) // align) * align
    tb = min(tb, b_aligned)
    # Force >= 2 tiles when there is enough work, so the "parallel" grid axis
    # can shard across both TensorCores on v7x.
    if tb >= B and B >= 2 * align:
        half = (B + 1) // 2
        tb = ((half + align - 1) // align) * align
    return tb


def clase_clasificacion_forward(x, weight, bias):
    """Equivalent of PyTorch nn.Linear(input_dim, 8): y = x @ weight.T + bias.

    x:      [..., D]  (float32 or bfloat16)
    weight: [8, D]    (PyTorch layout)
    bias:   [8]
    returns [..., 8]  in x.dtype
    """
    orig_shape = x.shape
    D = orig_shape[-1]
    out_dim = weight.shape[0]

    x2d = x.reshape(-1, D)
    B = x2d.shape[0]

    # One-time layout fixes in the wrapper (negligible HBM traffic).
    w_t = jnp.asarray(weight).T                   # (D, 8): MXU [K, N] order
    b2d = jnp.asarray(bias).reshape(1, out_dim)   # (1, 8) for 2-D broadcast

    x_itemsize = jnp.dtype(x2d.dtype).itemsize
    vmem_limit = _vmem_limit_bytes()
    tb = _pick_batch_tile(B, D, x_itemsize, vmem_limit)
    grid = (pl.cdiv(B, tb),)

    cost = pl.CostEstimate(
        flops=2 * B * D * out_dim,
        transcendentals=0,
        bytes_accessed=(B * D * x_itemsize
                        + D * out_dim * jnp.dtype(w_t.dtype).itemsize
                        + B * out_dim * x_itemsize
                        + out_dim * jnp.dtype(b2d.dtype).itemsize),
    )

    out2d = pl.pallas_call(
        _linear_kernel,
        out_shape=jax.ShapeDtypeStruct((B, out_dim), x2d.dtype),
        grid=grid,
        in_specs=[
            pl.BlockSpec((tb, D), lambda i: (i, 0)),          # x streams by batch tile
            pl.BlockSpec((D, out_dim), lambda i: (0, 0)),     # weight resident
            pl.BlockSpec((1, out_dim), lambda i: (0, 0)),     # bias resident
        ],
        out_specs=pl.BlockSpec((tb, out_dim), lambda i: (i, 0)),
        compiler_params=pltpu.CompilerParams(
            dimension_semantics=("parallel",),
            vmem_limit_bytes=vmem_limit,
        ),
        cost_estimate=cost,
    )(x2d, w_t, b2d)

    return out2d.reshape(*orig_shape[:-1], out_dim)


if __name__ == "__main__":
    key = jax.random.PRNGKey(0)
    k_x, k_w, k_b = jax.random.split(key, 3)

    batch = 8
    input_dim = 32
    out_dim = 8

    # Deterministic synthetic parameters (PyTorch nn.Linear-style uniform init).
    bound = 1.0 / (input_dim ** 0.5)
    x = jax.random.normal(k_x, (batch, input_dim), dtype=jnp.float32)
    weight = jax.random.uniform(k_w, (out_dim, input_dim), dtype=jnp.float32,
                                minval=-bound, maxval=bound)
    bias = jax.random.uniform(k_b, (out_dim,), dtype=jnp.float32,
                              minval=-bound, maxval=bound)

    y = clase_clasificacion_forward(x, weight, bias)
    y = jax.block_until_ready(y)

    # Sanity check against plain-JAX reference.
    y_ref = x @ weight.T + bias
    assert y.shape == (batch, out_dim)
    assert jnp.allclose(y, y_ref, atol=1e-5, rtol=1e-5), "mismatch vs reference"

    print("KERNEL_OK")
</pallas_src>

<mosaic_0001>
module attributes {stable_mosaic.version = 11 : i64} {
  func.func @_linear_kernel(%arg0: i32, %arg1: memref<8x32xf32, #tpu.memory_space<vmem>>, %arg2: memref<32x8xf32, #tpu.memory_space<vmem>>, %arg3: memref<1x8xf32, #tpu.memory_space<vmem>>, %arg4: memref<8x8xf32, #tpu.memory_space<vmem>>) attributes {dimension_semantics = [#tpu.dimension_semantics<parallel>], iteration_bounds = array<i64: 1>, scalar_prefetch = 0 : i64, scratch_operands = 0 : i64, tpu.core_type = #tpu.core_type<tc>, window_params = [{transform_indices = @transform_0, window_bounds = array<i64: 8, 32>}, {pipeline_mode = #tpu.pipeline_mode<synchronous>, transform_indices = @transform_1, window_bounds = array<i64: 32, 8>}, {pipeline_mode = #tpu.pipeline_mode<synchronous>, transform_indices = @transform_2, window_bounds = array<i64: 1, 8>}, {transform_indices = @transform_3, window_bounds = array<i64: 8, 8>}]} {
    %c0 = arith.constant 0 : index
    %c0_0 = arith.constant 0 : index
    %0 = vector.load %arg1[%c0, %c0_0] : memref<8x32xf32, #tpu.memory_space<vmem>>, vector<8x32xf32>
    %c0_1 = arith.constant 0 : index
    %c0_2 = arith.constant 0 : index
    %1 = vector.load %arg2[%c0_1, %c0_2] : memref<32x8xf32, #tpu.memory_space<vmem>>, vector<32x8xf32>
    %cst = arith.constant dense<0.000000e+00> : vector<8x8xf32>
    %2 = tpu.matmul %0, %1, %cst {dimension_numbers = #tpu.dot_dimension_numbers<[1], [0], [0], [1], [0, 0, 1, 1], [], []>} : vector<8x32xf32>, vector<32x8xf32>, vector<8x8xf32> -> vector<8x8xf32>
    %c0_3 = arith.constant 0 : index
    %c0_4 = arith.constant 0 : index
    %3 = vector.load %arg3[%c0_3, %c0_4] : memref<1x8xf32, #tpu.memory_space<vmem>>, vector<1x8xf32>
    %4 = vector.broadcast %3 : vector<1x8xf32> to vector<8x8xf32>
    %5 = arith.addf %2, %4 : vector<8x8xf32>
    %c0_5 = arith.constant 0 : index
    %c0_6 = arith.constant 0 : index
    %6 = vector.load %arg4[%c0_5, %c0_6] : memref<8x8xf32, #tpu.memory_space<vmem>>, vector<8x8xf32>
    tpu.vector_store %arg4[%c0_5, %c0_6], %5 {strides = array<i32>} : memref<8x8xf32, #tpu.memory_space<vmem>>, vector<8x8xf32>,
    return
  }
  func.func @transform_0(%arg0: i32) -> (i32, i32) {
    %c0_i32 = arith.constant 0 : i32
    %c0_i32_0 = arith.constant 0 : i32
    return %arg0, %c0_i32 : i32, i32
  }
  func.func @transform_1(%arg0: i32) -> (i32, i32) {
    %c0_i32 = arith.constant 0 : i32
    %c0_i32_0 = arith.constant 0 : i32
    %c0_i32_1 = arith.constant 0 : i32
    return %c0_i32, %c0_i32_0 : i32, i32
  }
  func.func @transform_2(%arg0: i32) -> (i32, i32) {
    %c0_i32 = arith.constant 0 : i32
    %c0_i32_0 = arith.constant 0 : i32
    %c0_i32_1 = arith.constant 0 : i32
    return %c0_i32, %c0_i32_0 : i32, i32
  }
  func.func @transform_3(%arg0: i32) -> (i32, i32) {
    %c0_i32 = arith.constant 0 : i32
    %c0_i32_0 = arith.constant 0 : i32
    return %arg0, %c0_i32 : i32, i32
  }
}

</mosaic_0001>

<bundles_post_ra>
// kernel: tpu_custom_call.1
= control target key start
LH: loop header
LB: loop body
LE: loop exit
PB: predicated region body
PF: predicated region fallthrough
CT: control target
= control target key end

     0   :  { %v160_v1 = vmov 0.0   ;;  %vm161_vm0 = vmmov 0   ;;  %s204_s0 = inlined_call_operand.vmem [shape: f32[8,32], index: 0, kind: input, shape index: {}]   ;;  %s205_s1 = inlined_call_operand.vmem [shape: f32[32,8], index: 1, kind: input, shape index: {}]   ;;  %s206_s2 = inlined_call_operand.vmem [shape: f32[1,8], index: 2, kind: input, shape index: {}]   ;;  %s207_s3 = inlined_call_operand.hbm [shape: f32[8,8], index: 3, kind: output, shape index: {}]  }
   0x1   :  { %v19_v0 = vld [vmem:[%s205_s1 + $0x18] sm:$0xff]  ;;  %124 = vmatprep.subr.mxu0 %v160_v1  ;;  %v18_v2 = vld [vmem:[%s205_s1 + $0x10] sm:$0xff]  ;;  %132 = vmatprep.mubr.msk.f32.mxu0 %vm161_vm0, %v160_v1 }
   0x2   :  { %125 = vmatpush3.msra.mxu0 %v19_v0 }
   0x3   :  { %8 = vsyncpa [#allocation3], 0  ;;  %126 = vmatprep.subr.mxu0 %v160_v1  ;;  %v17_v3 = vld [vmem:[%s205_s1 + $0x8] sm:$0xff]  ;;  %v16_v4 = vld [vmem:[%s205_s1] sm:$0xff]  ;;  %vm27_vm1 = vcmask 261120   ;;  %s162_s24 = smov [#allocation2]  }
   0x4   :  { %127 = vmatpush3.msra.mxu0 %v18_v2  ;;  %v15_v5 = vld [vmem:[%s204_s0] sm:$0xff]  ;;  %s109_s25 = sshll.u32 %s162_s24, 4  ;;  %vm101_vm2 = vcmask 64512   ;;  %s110_s25 = int_to_ptr.vmem [resolvable:$true] %s109_s25 }
   0x5   :  { %128 = vmatprep.subr.mxu0 %v160_v1  ;;  %v117_v6 = vld [vmem:[%s206_s2] ss:$0 sm:$0xff]  ;;  %s138_s1 = scalar_lea.vmem %s110_s25, 128  ;;  %p143_p1 = scmp.lt.s32.totalorder %s110_s25, %s110_s25 }
   0x6   :  { %129 = vmatpush3.msra.mxu0 %v17_v3  ;;  %p139_p0 = scmp.ne.s32.totalorder %s110_s25, %s138_s1  ;;  %p144_p2 = scmp.lt.s32.totalorder %s138_s1, %s138_s1 }
   0x7   :  { %130 = vmatprep.subr.mxu0 %v160_v1 }
   0x8   :  { %131 = vmatpush3.msra.mxu0 %v16_v4  ;;  %p145_p3 = por %p144_p2, %p143_p1 }
   0x9   :  { %133 = vmatmul.mubr.msk.f32.vlgmr.msra.gmra.mxu0 %vm27_vm1, %v15_v5 }
   0xa   :  { %p146_p4 = pnand %p145_p3, %p139_p0 }
  0xc9   :  { %v97_v7 = vpop.f32.mrf.mxu0 }
  0xca   :  { %v98_v8 = vadd.f32 %v117_v6, %v97_v7 }
  0xcb   :  { %v134_v9 = vpop.f32.mrf.mxu0 }
  0xcc   :  { %102 = vst.msk [vmem:[#allocation2] sm:$0xff] %vm101_vm2, %v98_v8 }
  0xcd   :  { %149 = shalt.err (!%p146_p4)
}
  0xce   :  { %112 = dma.vmem_to_hbm [thread:$0]  %s110_s25, 128, %s207_s3, [#allocation3]  }
  0xcf   :  { %158 = dma.done.wait [#allocation3], 128  }
  0xd0   :  { %159 = vsyncadd [#allocation3], 4294967168 }
  0xd1   :  { %116 = vsyncpa [#allocation3], 1 }

</bundles_post_ra>
